<compile_context>
chip_gen: v7x
topology: tpu7x:2x2x1
jax: 0.10.0
libtpu: 0.0.40
codegen_flags: <defaults>
</compile_context>

<pallas_src>
import functools

import jax
import jax.numpy as jnp
from jax import lax
from jax.experimental import pallas as pl
from jax.experimental.pallas import tpu as pltpu


def _gcn_kernel(x_q_ref, x_kv_ref, wqkv_ref, w1_ref, b1_ref,
                wox_ref, wog_ref, b2_ref, out_ref, *, inter, compute_dtype):
    f32 = jnp.float32
    x_q = x_q_ref[...].astype(compute_dtype)        # (TB, Cin)  query rows of this tile
    x_kv = x_kv_ref[...].astype(compute_dtype)      # (B,  Cin)  full batch (keys/values)

    wqkv = wqkv_ref[...].astype(compute_dtype)      # (Cin, 3*inter) = [Wq | Wk | Wv*c^-0.5]

    # Projections: q for this tile, fused k/(pre-scaled) v for the full batch.
    q = jnp.dot(x_q, wqkv[:, :inter], preferred_element_type=f32)           # (TB, C)
    kv = jnp.dot(x_kv, wqkv[:, inter:], preferred_element_type=f32)         # (B, 2C)
    k = kv[:, :inter]
    v = kv[:, inter:]                               # already carries the c^-0.5 scale

    # sim = q @ k^T without materializing a transpose: contract shared last dim.
    sim = lax.dot_general(q, k, (((1,), (1,)), ((), ())),
                          preferred_element_type=f32)                       # (TB, B)
    sim = sim - jnp.max(sim, axis=-1, keepdims=True)
    p = jnp.exp(sim)
    # Exact reciprocal: approx=True (~12-bit) can breach the 1e-4 tolerance here.
    p = p * pl.reciprocal(jnp.sum(p, axis=-1, keepdims=True), approx=False)

    # gcn_feats = softmax(sim) @ (v * c^-0.5), then BN-folded conv1 + ReLU.
    g = jnp.dot(p.astype(compute_dtype), v.astype(compute_dtype),
                preferred_element_type=f32)                                  # (TB, C)
    h = jnp.dot(g.astype(compute_dtype), w1_ref[...].astype(compute_dtype),
                preferred_element_type=f32) + b1_ref[...]                    # (TB, Cin)
    h = jnp.maximum(h, 0.0)

    # out_conv on concat([x, h]) == x @ Wo_top + h @ Wo_bottom (BN folded) + ReLU.
    o = (jnp.dot(x_q, wox_ref[...].astype(compute_dtype), preferred_element_type=f32) +
         jnp.dot(h.astype(compute_dtype), wog_ref[...].astype(compute_dtype),
                 preferred_element_type=f32) + b2_ref[...])                  # (TB, Cout)
    out_ref[...] = jnp.maximum(o, 0.0).astype(out_ref.dtype)


def _pick_batch_tile(b):
    # Largest clean query-tile; attention needs every key/value row, so ragged
    # batches fall back to one tile (keeps softmax semantics exact, no padding).
    for tb in (512, 256, 128):
        if b % tb == 0:
            return tb
    return b


def gcn_forward(x, fused, *, compute_dtype=jnp.float32):
    """x: (B, input_plane) f32. fused: dict from fold_params()."""
    B, cin = x.shape
    inter = fused["w1"].shape[0]
    cout = fused["wo_x"].shape[1]

    tb = _pick_batch_tile(B)
    n_tiles = B // tb

    kernel = functools.partial(_gcn_kernel, inter=inter, compute_dtype=compute_dtype)

    def bcast(a):
        # Constant index_map -> operand DMA'd once and kept resident across tiles.
        return pl.BlockSpec(a.shape, lambda i, _nd=len(a.shape): (0,) * _nd)

    return pl.pallas_call(
        kernel,
        out_shape=jax.ShapeDtypeStruct((B, cout), jnp.float32),
        grid=(n_tiles,),
        in_specs=[
            pl.BlockSpec((tb, cin), lambda i: (i, 0)),   # x: query rows of this tile
            pl.BlockSpec((B, cin), lambda i: (0, 0)),    # x: full batch for keys/values
            bcast(fused["w_qkv"]),
            bcast(fused["w1"]), bcast(fused["b1"]),
            bcast(fused["wo_x"]), bcast(fused["wo_g"]), bcast(fused["b2"]),
        ],
        out_specs=pl.BlockSpec((tb, cout), lambda i: (i, 0)),
        compiler_params=pltpu.CompilerParams(
            dimension_semantics=("parallel",),    # shards tiles across TCs on v7x
            vmem_limit_bytes=48 << 20,            # safe on v7x (64 MiB phys), > default on v6e
        ),
    )(x, x, fused["w_qkv"], fused["w1"], fused["b1"],
      fused["wo_x"], fused["wo_g"], fused["b2"])
    # TODO(synk): for very large B the (TB, B) softmax tile should be flash-tiled
    # over keys/values (online softmax) to bound VMEM on v7x.


def init_params(key, input_plane, output_plane):
    """Raw, PyTorch-layout-equivalent params (weights stored as (in, out))."""
    inter = input_plane // 2
    ks = jax.random.split(key, 11)
    scale = lambda fan_in: 1.0 / jnp.sqrt(jnp.float32(fan_in))
    wk = jax.random.normal(ks[0], (input_plane, inter), jnp.float32) * scale(input_plane)
    wv = jax.random.normal(ks[1], (input_plane, inter), jnp.float32) * scale(input_plane)
    wq = jax.random.normal(ks[2], (input_plane, inter), jnp.float32) * scale(input_plane)
    w1 = jax.random.normal(ks[3], (inter, input_plane), jnp.float32) * scale(inter)
    wo = jax.random.normal(ks[4], (2 * input_plane, output_plane), jnp.float32) * scale(2 * input_plane)
    # Eval-mode BatchNorm parameters / running stats (randomized to exercise the fold).
    g1 = 1.0 + 0.1 * jax.random.normal(ks[5], (1, input_plane), jnp.float32)
    b1 = 0.1 * jax.random.normal(ks[6], (1, input_plane), jnp.float32)
    m1 = 0.1 * jax.random.normal(ks[7], (1, input_plane), jnp.float32)
    v1 = 1.0 + 0.1 * jax.random.uniform(ks[8], (1, input_plane), jnp.float32)
    g2 = 1.0 + 0.1 * jax.random.normal(ks[9], (1, output_plane), jnp.float32)
    b2 = 0.1 * jax.random.normal(ks[10], (1, output_plane), jnp.float32)
    m2 = jnp.zeros((1, output_plane), jnp.float32)
    v2 = jnp.ones((1, output_plane), jnp.float32)
    return dict(wk=wk, wv=wv, wq=wq, w1=w1, wo=wo,
                g1=g1, b1=b1, m1=m1, v1=v1,
                g2=g2, b2=b2, m2=m2, v2=v2)


def fold_params(p, eps=1e-5):
    """Wrapper-side fusion: QKV concat, c^-0.5 into V, eval-mode BN into weights."""
    cin, inter = p["wk"].shape
    vscale = float(inter) ** -0.5

    w_qkv = jnp.concatenate([p["wq"], p["wk"], p["wv"] * vscale], axis=1)   # (Cin, 3*inter)

    s1 = p["g1"] / jnp.sqrt(p["v1"] + eps)                                  # (1, Cin)
    w1f = p["w1"] * s1                                                      # (inter, Cin)
    b1f = p["b1"] - p["m1"] * s1                                            # (1, Cin)

    s2 = p["g2"] / jnp.sqrt(p["v2"] + eps)                                  # (1, Cout)
    wof = p["wo"] * s2                                                      # (2*Cin, Cout)
    b2f = p["b2"] - p["m2"] * s2                                            # (1, Cout)

    return dict(w_qkv=w_qkv, w1=w1f, b1=b1f,
                wo_x=wof[:cin], wo_g=wof[cin:], b2=b2f)


def gcn_reference(x, p, eps=1e-5):
    """Pure-JAX mirror of the PyTorch forward (eval-mode BN), unfused params."""
    k = x @ p["wk"]; v = x @ p["wv"]; q = x @ p["wq"]
    c = k.shape[1]
    sim = jax.nn.softmax(q @ k.T, axis=-1) * (c ** -0.5)
    g = sim @ v
    h = g @ p["w1"]
    h = (h - p["m1"]) / jnp.sqrt(p["v1"] + eps) * p["g1"] + p["b1"]
    h = jnp.maximum(h, 0.0)
    o = jnp.concatenate([x, h], axis=1) @ p["wo"]
    o = (o - p["m2"]) / jnp.sqrt(p["v2"] + eps) * p["g2"] + p["b2"]
    return jnp.maximum(o, 0.0)


if __name__ == "__main__":
    B, input_plane, output_plane = 8, 64, 32

    key = jax.random.PRNGKey(0)
    kx, kp = jax.random.split(key)
    x = jax.random.normal(kx, (B, input_plane), jnp.float32)

    raw = init_params(kp, input_plane, output_plane)
    fused = fold_params(raw)

    out = gcn_forward(x, fused)            # f32 MXU path (bf16 opt-in via compute_dtype)
    out = jax.block_until_ready(out)

    ref = gcn_reference(x, raw)
    assert out.shape == (B, output_plane)
    assert jnp.allclose(out, ref, atol=1e-4, rtol=1e-4), "mismatch vs JAX reference"

    print("KERNEL_OK")
</pallas_src>

<mosaic_0001>
module attributes {stable_mosaic.version = 11 : i64} {
  func.func @_gcn_kernel(%arg0: i32, %arg1: memref<8x64xf32, #tpu.memory_space<vmem>>, %arg2: memref<8x64xf32, #tpu.memory_space<vmem>>, %arg3: memref<64x96xf32, #tpu.memory_space<vmem>>, %arg4: memref<32x64xf32, #tpu.memory_space<vmem>>, %arg5: memref<1x64xf32, #tpu.memory_space<vmem>>, %arg6: memref<64x32xf32, #tpu.memory_space<vmem>>, %arg7: memref<64x32xf32, #tpu.memory_space<vmem>>, %arg8: memref<1x32xf32, #tpu.memory_space<vmem>>, %arg9: memref<8x32xf32, #tpu.memory_space<vmem>>) attributes {dimension_semantics = [#tpu.dimension_semantics<parallel>], iteration_bounds = array<i64: 1>, scalar_prefetch = 0 : i64, scratch_operands = 0 : i64, tpu.core_type = #tpu.core_type<tc>, window_params = [{transform_indices = @transform_0, window_bounds = array<i64: 8, 64>}, {pipeline_mode = #tpu.pipeline_mode<synchronous>, transform_indices = @transform_1, window_bounds = array<i64: 8, 64>}, {pipeline_mode = #tpu.pipeline_mode<synchronous>, transform_indices = @transform_2, window_bounds = array<i64: 64, 96>}, {pipeline_mode = #tpu.pipeline_mode<synchronous>, transform_indices = @transform_3, window_bounds = array<i64: 32, 64>}, {pipeline_mode = #tpu.pipeline_mode<synchronous>, transform_indices = @transform_4, window_bounds = array<i64: 1, 64>}, {pipeline_mode = #tpu.pipeline_mode<synchronous>, transform_indices = @transform_5, window_bounds = array<i64: 64, 32>}, {pipeline_mode = #tpu.pipeline_mode<synchronous>, transform_indices = @transform_6, window_bounds = array<i64: 64, 32>}, {pipeline_mode = #tpu.pipeline_mode<synchronous>, transform_indices = @transform_7, window_bounds = array<i64: 1, 32>}, {transform_indices = @transform_8, window_bounds = array<i64: 8, 32>}]} {
    %c0 = arith.constant 0 : index
    %c0_0 = arith.constant 0 : index
    %0 = vector.load %arg1[%c0, %c0_0] : memref<8x64xf32, #tpu.memory_space<vmem>>, vector<8x64xf32>
    %c0_1 = arith.constant 0 : index
    %c0_2 = arith.constant 0 : index
    %1 = vector.load %arg2[%c0_1, %c0_2] : memref<8x64xf32, #tpu.memory_space<vmem>>, vector<8x64xf32>
    %c0_3 = arith.constant 0 : index
    %c0_4 = arith.constant 0 : index
    %2 = vector.load %arg3[%c0_3, %c0_4] : memref<64x96xf32, #tpu.memory_space<vmem>>, vector<64x96xf32>
    %3 = vector.extract_strided_slice %2 {offsets = [0, 0], sizes = [64, 32], strides = [1, 1]} : vector<64x96xf32> to vector<64x32xf32>
    %cst = arith.constant dense<0.000000e+00> : vector<8x32xf32>
    %4 = tpu.matmul %0, %3, %cst {dimension_numbers = #tpu.dot_dimension_numbers<[1], [0], [0], [1], [0, 0, 1, 1], [], []>} : vector<8x64xf32>, vector<64x32xf32>, vector<8x32xf32> -> vector<8x32xf32>
    %5 = vector.extract_strided_slice %2 {offsets = [0, 32], sizes = [64, 64], strides = [1, 1]} : vector<64x96xf32> to vector<64x64xf32>
    %cst_5 = arith.constant dense<0.000000e+00> : vector<8x64xf32>
    %6 = tpu.matmul %1, %5, %cst_5 {dimension_numbers = #tpu.dot_dimension_numbers<[1], [0], [0], [1], [0, 0, 1, 1], [], []>} : vector<8x64xf32>, vector<64x64xf32>, vector<8x64xf32> -> vector<8x64xf32>
    %7 = vector.extract_strided_slice %6 {offsets = [0, 0], sizes = [8, 32], strides = [1, 1]} : vector<8x64xf32> to vector<8x32xf32>
    %8 = vector.extract_strided_slice %6 {offsets = [0, 32], sizes = [8, 32], strides = [1, 1]} : vector<8x64xf32> to vector<8x32xf32>
    %cst_6 = arith.constant dense<0.000000e+00> : vector<8x8xf32>
    %9 = tpu.matmul %4, %7, %cst_6 {dimension_numbers = #tpu.dot_dimension_numbers<[1], [1], [0], [0], [0, 0, 1, 0], [], []>} : vector<8x32xf32>, vector<8x32xf32>, vector<8x8xf32> -> vector<8x8xf32>
    %cst_7 = arith.constant dense<0xFF800000> : vector<8xf32>
    %10 = vector.multi_reduction <maximumf>, %9, %cst_7 [1] : vector<8x8xf32> to vector<8xf32>
    %11 = vector.shape_cast %10 : vector<8xf32> to vector<8x1xf32>
    %12 = vector.broadcast %11 : vector<8x1xf32> to vector<8x8xf32>
    %13 = arith.subf %9, %12 : vector<8x8xf32>
    %14 = math.exp %13 : vector<8x8xf32>
    %cst_8 = arith.constant dense<0.000000e+00> : vector<8xf32>
    %15 = vector.multi_reduction <add>, %14, %cst_8 [1] : vector<8x8xf32> to vector<8xf32>
    %16 = vector.shape_cast %15 : vector<8xf32> to vector<8x1xf32>
    %17 = tpu.reciprocal %16 : vector<8x1xf32> -> vector<8x1xf32>
    %18 = vector.broadcast %17 : vector<8x1xf32> to vector<8x8xf32>
    %19 = arith.mulf %14, %18 : vector<8x8xf32>
    %cst_9 = arith.constant dense<0.000000e+00> : vector<8x32xf32>
    %20 = tpu.matmul %19, %8, %cst_9 {dimension_numbers = #tpu.dot_dimension_numbers<[1], [0], [0], [1], [0, 0, 1, 1], [], []>} : vector<8x8xf32>, vector<8x32xf32>, vector<8x32xf32> -> vector<8x32xf32>
    %c0_10 = arith.constant 0 : index
    %c0_11 = arith.constant 0 : index
    %21 = vector.load %arg4[%c0_10, %c0_11] : memref<32x64xf32, #tpu.memory_space<vmem>>, vector<32x64xf32>
    %cst_12 = arith.constant dense<0.000000e+00> : vector<8x64xf32>
    %22 = tpu.matmul %20, %21, %cst_12 {dimension_numbers = #tpu.dot_dimension_numbers<[1], [0], [0], [1], [0, 0, 1, 1], [], []>} : vector<8x32xf32>, vector<32x64xf32>, vector<8x64xf32> -> vector<8x64xf32>
    %c0_13 = arith.constant 0 : index
    %c0_14 = arith.constant 0 : index
    %23 = vector.load %arg5[%c0_13, %c0_14] : memref<1x64xf32, #tpu.memory_space<vmem>>, vector<1x64xf32>
    %24 = vector.broadcast %23 : vector<1x64xf32> to vector<8x64xf32>
    %25 = arith.addf %22, %24 : vector<8x64xf32>
    %cst_15 = arith.constant 0.000000e+00 : f32
    %26 = vector.broadcast %cst_15 : f32 to vector<8x64xf32>
    %27 = arith.maximumf %25, %26 : vector<8x64xf32>
    %c0_16 = arith.constant 0 : index
    %c0_17 = arith.constant 0 : index
    %28 = vector.load %arg6[%c0_16, %c0_17] : memref<64x32xf32, #tpu.memory_space<vmem>>, vector<64x32xf32>
    %cst_18 = arith.constant dense<0.000000e+00> : vector<8x32xf32>
    %29 = tpu.matmul %0, %28, %cst_18 {dimension_numbers = #tpu.dot_dimension_numbers<[1], [0], [0], [1], [0, 0, 1, 1], [], []>} : vector<8x64xf32>, vector<64x32xf32>, vector<8x32xf32> -> vector<8x32xf32>
    %c0_19 = arith.constant 0 : index
    %c0_20 = arith.constant 0 : index
    %30 = vector.load %arg7[%c0_19, %c0_20] : memref<64x32xf32, #tpu.memory_space<vmem>>, vector<64x32xf32>
    %cst_21 = arith.constant dense<0.000000e+00> : vector<8x32xf32>
    %31 = tpu.matmul %27, %30, %cst_21 {dimension_numbers = #tpu.dot_dimension_numbers<[1], [0], [0], [1], [0, 0, 1, 1], [], []>} : vector<8x64xf32>, vector<64x32xf32>, vector<8x32xf32> -> vector<8x32xf32>
    %32 = arith.addf %29, %31 : vector<8x32xf32>
    %c0_22 = arith.constant 0 : index
    %c0_23 = arith.constant 0 : index
    %33 = vector.load %arg8[%c0_22, %c0_23] : memref<1x32xf32, #tpu.memory_space<vmem>>, vector<1x32xf32>
    %34 = vector.broadcast %33 : vector<1x32xf32> to vector<8x32xf32>
    %35 = arith.addf %32, %34 : vector<8x32xf32>
    %cst_24 = arith.constant 0.000000e+00 : f32
    %36 = vector.broadcast %cst_24 : f32 to vector<8x32xf32>
    %37 = arith.maximumf %35, %36 : vector<8x32xf32>
    %c0_25 = arith.constant 0 : index
    %c0_26 = arith.constant 0 : index
    %38 = vector.load %arg9[%c0_25, %c0_26] : memref<8x32xf32, #tpu.memory_space<vmem>>, vector<8x32xf32>
    tpu.vector_store %arg9[%c0_25, %c0_26], %37 {strides = array<i32>} : memref<8x32xf32, #tpu.memory_space<vmem>>, vector<8x32xf32>,
    return
  }
  func.func @transform_0(%arg0: i32) -> (i32, i32) {
    %c0_i32 = arith.constant 0 : i32
    %c0_i32_0 = arith.constant 0 : i32
    return %arg0, %c0_i32 : i32, i32
  }
  func.func @transform_1(%arg0: i32) -> (i32, i32) {
    %c0_i32 = arith.constant 0 : i32
    %c0_i32_0 = arith.constant 0 : i32
    %c0_i32_1 = arith.constant 0 : i32
    return %c0_i32, %c0_i32_0 : i32, i32
  }
  func.func @transform_2(%arg0: i32) -> (i32, i32) {
    %c0_i32 = arith.constant 0 : i32
    %c0_i32_0 = arith.constant 0 : i32
    %c0_i32_1 = arith.constant 0 : i32
    return %c0_i32, %c0_i32_0 : i32, i32
  }
  func.func @transform_3(%arg0: i32) -> (i32, i32) {
    %c0_i32 = arith.constant 0 : i32
    %c0_i32_0 = arith.constant 0 : i32
    %c0_i32_1 = arith.constant 0 : i32
    return %c0_i32, %c0_i32_0 : i32, i32
  }
  func.func @transform_4(%arg0: i32) -> (i32, i32) {
    %c0_i32 = arith.constant 0 : i32
    %c0_i32_0 = arith.constant 0 : i32
    %c0_i32_1 = arith.constant 0 : i32
    return %c0_i32, %c0_i32_0 : i32, i32
  }
  func.func @transform_5(%arg0: i32) -> (i32, i32) {
    %c0_i32 = arith.constant 0 : i32
    %c0_i32_0 = arith.constant 0 : i32
    %c0_i32_1 = arith.constant 0 : i32
    return %c0_i32, %c0_i32_0 : i32, i32
  }
  func.func @transform_6(%arg0: i32) -> (i32, i32) {
    %c0_i32 = arith.constant 0 : i32
    %c0_i32_0 = arith.constant 0 : i32
    %c0_i32_1 = arith.constant 0 : i32
    return %c0_i32, %c0_i32_0 : i32, i32
  }
  func.func @transform_7(%arg0: i32) -> (i32, i32) {
    %c0_i32 = arith.constant 0 : i32
    %c0_i32_0 = arith.constant 0 : i32
    %c0_i32_1 = arith.constant 0 : i32
    return %c0_i32, %c0_i32_0 : i32, i32
  }
  func.func @transform_8(%arg0: i32) -> (i32, i32) {
    %c0_i32 = arith.constant 0 : i32
    %c0_i32_0 = arith.constant 0 : i32
    return %arg0, %c0_i32 : i32, i32
  }
}

</mosaic_0001>

<bundles_post_ra>
// kernel: tpu_custom_call.1
= control target key start
LH: loop header
LB: loop body
LE: loop exit
PB: predicated region body
PF: predicated region fallthrough
CT: control target
= control target key end

     0   :  { %v911_v7 = vmov 0.0|0.0   ;;  %s1123_s0 = inlined_call_operand.vmem [shape: f32[8,64], index: 0, kind: input, shape index: {}]   ;;  %s1124_s1 = inlined_call_operand.vmem [shape: f32[8,64], index: 1, kind: input, shape index: {}]   ;;  %s1125_s2 = inlined_call_operand.vmem [shape: f32[64,96], index: 2, kind: input, shape index: {}]   ;;  %s1126_s3 = inlined_call_operand.vmem [shape: f32[32,64], index: 3, kind: input, shape index: {}]   ;;  %s1127_s4 = inlined_call_operand.vmem [shape: f32[1,64], index: 4, kind: input, shape index: {}]   ;;  %s1128_s5 = inlined_call_operand.vmem [shape: f32[64,32], index: 5, kind: input, shape index: {}]   ;;  %s1129_s6 = inlined_call_operand.vmem [shape: f32[64,32], index: 6, kind: input, shape index: {}]   ;;  %s1130_s7 = inlined_call_operand.vmem [shape: f32[1,32], index: 7, kind: input, shape index: {}]   ;;  %s1131_s8 = inlined_call_operand.hbm [shape: f32[8,32], index: 8, kind: output, shape index: {}]  }
   0x1   :  { %v32_v0 = vld [vmem:[%s1125_s2] sm:$0xff]  ;;  %v33_v1 = vld [vmem:[%s1125_s2 + $0x8] sm:$0xff]  ;;  %v34_v2 = vld [vmem:[%s1125_s2 + $0x10] sm:$0xff]  ;;  %816 = vmatprep.subr.bf16.mxu1 %v911_v7  ;;  %804 = vmatprep.subr.bf16.mxu0 %v911_v7 }
   0x2   :  { %v863_v3 = vpack.i.bf16 %v33_v1, %v32_v0  ;;  %v35_v4 = vld [vmem:[%s1125_s2 + $0x18] sm:$0xff]  ;;  %v36_v5 = vld [vmem:[%s1125_s2 + $0x20] sm:$0xff]  ;;  %v37_v6 = vld [vmem:[%s1125_s2 + $0x28] sm:$0xff]  ;;  %v805_v8 = vpack.c.bf16 %v33_v1, %v32_v0 }
   0x3   :  { %v873_v9 = vpack.i.bf16 %v37_v6, %v36_v5  ;;  %v38_v10 = vld [vmem:[%s1125_s2 + $0x30] sm:$0xff]  ;;  %v39_v11 = vld [vmem:[%s1125_s2 + $0x38] sm:$0xff] }
   0x4   :  { %13 = vsyncpa [#allocation3], 0  ;;  %s912_s21 = smov 96   ;;  %v868_v12 = vpack.i.bf16 %v35_v4, %v34_v2  ;;  %806 = vmatpush3.bf16.msra.mxu0 %v805_v8  ;;  %v808_v13 = vpack.c.bf16 %v35_v4, %v34_v2  ;;  %v878_v14 = vpack.i.bf16 %v39_v11, %v38_v10  ;;  %v811_v15 = vpack.c.bf16 %v37_v6, %v36_v5  ;;  %v1001_v18 = vld [vmem:[%s1123_s0] sm:$0xff]  ;;  %v385_v50 = vld [vmem:[%s1126_s3 + $0x8] sm:$0xff]  ;;  %s915_s16 = smov [#allocation2]  }
   0x5   :  { %864 = vrot.lane.b32.xlu0 %v863_v3, %s912_s21  ;;  %874 = vrot.lane.b32.xlu1 %v873_v9, %s912_s21  ;;  %vm913_vm0 = vmmov 0   ;;  %v914_v16 = vmov 0.0   ;;  %v814_v17 = vpack.c.bf16 %v39_v11, %v38_v10  ;;  %vm40_vm1 = vcmask 523264   ;;  %v31_v35 = vld [vmem:[%s1124_s1] sm:$0xff]  ;;  %v386_v51 = vld [vmem:[%s1126_s3 + $0x10] sm:$0xff]  ;;  %s644_s17 = sshll.u32 %s915_s16, 4  ;;  %s645_s17 = int_to_ptr.vmem [resolvable:$true] %s644_s17 }
   0x6   :  { %807 = vmatprep.subr.bf16.mxu0 %v911_v7  ;;  %742 = vmatprep.mubr.msk.f32.mxu1 %vm913_vm0, %v914_v16  ;;  %vm219_vm2 = vcmask 261120   ;;  %vm296_vm3 = vcmask 64512   ;;  %v384_v49 = vld [vmem:[%s1126_s3] sm:$0xff]  ;;  %v387_v53 = vld [vmem:[%s1126_s3 + $0x18] sm:$0xff]  ;;  %v478_v59 = vld [vmem:[%s1129_s6 + $0x8] sm:$0xff]  ;;  %p892_p1 = scmp.lt.s32.totalorder %s645_s17, %s645_s17 }
   0x7   :  { %723 = vmatprep.mubr.msk.f32.mxu0 %vm913_vm0, %v914_v16  ;;  %v829_v52 = vpack.c.bf16 %v385_v50, %v384_v49  ;;  %v832_v54 = vpack.c.bf16 %v387_v53, %v386_v51  ;;  %v477_v58 = vld [vmem:[%s1129_s6] sm:$0xff]  ;;  %v479_v61 = vld [vmem:[%s1129_s6 + $0x10] sm:$0xff]  ;;  %v480_v62 = vld [vmem:[%s1129_s6 + $0x18] sm:$0xff] }
   0x8   :  { %809 = vmatpush3.bf16.msra.mxu0 %v808_v13  ;;  %v835_v60 = vpack.c.bf16 %v478_v59, %v477_v58  ;;  %v838_v63 = vpack.c.bf16 %v480_v62, %v479_v61  ;;  %v481_v0 = vld [vmem:[%s1129_s6 + $0x20] sm:$0xff]  ;;  %v482_v1 = vld [vmem:[%s1129_s6 + $0x28] sm:$0xff]  ;;  %v471_v6 = vld [vmem:[%s1128_s5 + $0x10] sm:$0xff] }
   0x9   :  { %869 = vrot.lane.b32.xlu0 %v868_v12, %s912_s21  ;;  %879 = vrot.lane.b32.xlu1 %v878_v14, %s912_s21  ;;  %v841_v2 = vpack.c.bf16 %v482_v1, %v481_v0  ;;  %v469_v3 = vld [vmem:[%s1128_s5] sm:$0xff]  ;;  %v470_v4 = vld [vmem:[%s1128_s5 + $0x8] sm:$0xff] }
   0xa   :  { %810 = vmatprep.subr.bf16.mxu0 %v911_v7  ;;  %v847_v5 = vpack.c.bf16 %v470_v4, %v469_v3  ;;  %v472_v8 = vld [vmem:[%s1128_s5 + $0x18] sm:$0xff]  ;;  %v473_v12 = vld [vmem:[%s1128_s5 + $0x20] sm:$0xff]  ;;  %v474_v13 = vld [vmem:[%s1128_s5 + $0x28] sm:$0xff] }
   0xb   :  { %v850_v11 = vpack.c.bf16 %v472_v8, %v471_v6  ;;  %v853_v14 = vpack.c.bf16 %v474_v13, %v473_v12 }
   0xc   :  { %812 = vmatpush3.bf16.msra.mxu0 %v811_v15  ;;  %v475_v15 = vld [vmem:[%s1128_s5 + $0x30] sm:$0xff] }
   0xd   :  { %813 = vmatprep.subr.bf16.mxu0 %v911_v7 }
  0x10   :  { %815 = vmatpush3.bf16.msra.mxu0 %v814_v17  ;;  %v483_v17 = vld [vmem:[%s1129_s6 + $0x30] sm:$0xff] }
  0x11   :  { %828 = vmatprep.subr.bf16.mxu0 %v911_v7 }
  0x13   :  { %724 = vmatmul.mubr.msk.f32.vlgmr.msra.gmra.mrb[0].mxu0 %vm40_vm1, %v1001_v18 }
  0x14   :  { %763 = vmatprep.mubr.msk.f32.mxu0 %vm913_vm0, %v914_v16  ;;  %830 = vmatpush3.bf16.msra.mxu0 %v829_v52 }
  0x15   :  { %831 = vmatprep.subr.bf16.mxu0 %v911_v7 }
  0x18   :  { %833 = vmatpush3.bf16.msra.mxu0 %v832_v54 }
  0x19   :  { %846 = vmatprep.subr.bf16.mxu0 %v911_v7 }
  0x77   :  { %v865_v19 = vpop.permute.xlu0 %864  ;;  %v875_v22 = vpop.permute.xlu1 %874 }
  0x78   :  { %v867_v20 = vunpack.i.h.bf16 %v865_v19  ;;  %v866_v21 = vunpack.i.l.bf16 %v865_v19  ;;  %v877_v27 = vunpack.i.h.bf16 %v875_v22  ;;  %v876_v28 = vunpack.i.l.bf16 %v875_v22  ;;  %v484_v19 = vld [vmem:[%s1129_s6 + $0x38] sm:$0xff] }
  0x7a   :  { %v817_v23 = vpack.c.bf16 %v867_v20, %v866_v21  ;;  %v823_v31 = vpack.c.bf16 %v877_v27, %v876_v28  ;;  %v844_v21 = vpack.c.bf16 %v484_v19, %v483_v17 }
  0x7b   :  { %v870_v24 = vpop.permute.xlu0 %869  ;;  %v880_v29 = vpop.permute.xlu1 %879 }
  0x7c   :  { %v872_v25 = vunpack.i.h.bf16 %v870_v24  ;;  %v871_v26 = vunpack.i.l.bf16 %v870_v24  ;;  %818 = vmatpush3.bf16.msra.mxu1 %v817_v23  ;;  %v882_v32 = vunpack.i.h.bf16 %v880_v29  ;;  %v881_v33 = vunpack.i.l.bf16 %v880_v29  ;;  %v661_v29 = vld [vmem:[%s1130_s7] ss:$0 sm:$0xff] }
  0x7d   :  { %819 = vmatprep.subr.bf16.mxu1 %v911_v7 }
  0x7e   :  { %v820_v30 = vpack.c.bf16 %v872_v25, %v871_v26  ;;  %v826_v34 = vpack.c.bf16 %v882_v32, %v881_v33 }
  0x80   :  { %821 = vmatpush3.bf16.msra.mxu1 %v820_v30 }
  0x81   :  { %822 = vmatprep.subr.bf16.mxu1 %v911_v7 }
  0x84   :  { %824 = vmatpush3.bf16.msra.mxu1 %v823_v31 }
  0x85   :  { %825 = vmatprep.subr.bf16.mxu1 %v911_v7 }
  0x88   :  { %827 = vmatpush3.bf16.msra.mxu1 %v826_v34 }
  0x89   :  { %745 = vmatprep.subr.mxu1 %v914_v16 }
  0x8b   :  { %743 = vmatmul.mubr.msk.f32.vlgmr.msra.gmra.mrb[0].mxu1 %vm40_vm1, %v31_v35 }
  0x8c   :  { %747 = vmatprep.mubr.msk.f32.mxu1 %vm913_vm0, %v914_v16 }
  0xe6   :  { %v110_v36 = vpop.f32.mrb[0].mxu0 }
  0xe7   :  { %v725_v37 = vpop.f32.mrb[1].mxu0 }
 0x15e   :  { %v215_v38 = vpop.f32.mrb[0].mxu1 }
 0x15f   :  { %v744_v39 = vpop.f32.mrb[1].mxu1  ;;  %746 = vmatpush3.xpose.msk.msra.mxu1 %vm219_vm2, %v215_v38 }
 0x160   :  { %750 = vmatprep.subr.mxu1 %v914_v16 }
 0x162   :  { %748 = vmatmul.mubr.msk.f32.vlgmr.msra.gmra.mrb[2].mxu1 %vm219_vm2, %v110_v36 }
 0x163   :  { %752 = vmatprep.mubr.msk.f32.mxu1 %vm913_vm0, %v914_v16 }
 0x235   :  { %v292_v40 = vpop.f32.mrb[2].mxu1 }
 0x236   :  { %v749_v41 = vpop.f32.mrb[3].mxu1  ;;  %v297_v42 = vsel %vm296_vm3, %v292_v40, -inf }
 0x237   :  { %298 = vmax.xlane.f32.xlu0 %v297_v42 }
 0x24d   :  { %308 = vrot.lane.b32.xlu0 %v215_v38, %s912_s21 }
 0x2c4   :  { %v299_v43 = vpop.xlane.xlu0 %298 }
 0x2c5   :  { %v300_v44 = vsub.f32 %v292_v40, %v299_v43 }
 0x2c7   :  { %v301_v45 = vmul.f32 1.442695, %v300_v44 }
 0x2c8   :  { %v309_v46 = vpop.permute.xlu0 %308 }
 0x2c9   :  { %883 = vpow2.f32 %v301_v45  ;;  %751 = vmatpush3.msra.mxu1 %v309_v46 }
 0x2ca   :  { %834 = vmatprep.subr.bf16.mxu1 %v911_v7 }
 0x2d3   :  { %v884_v47 = vpop.eup %883 }
 0x2d4   :  { %v303_v48 = vsel %vm296_vm3, %v884_v47, 0.0 }
 0x2d5   :  { %304 = vadd.xlane.f32.xlu1 %v303_v48 }
 0x362   :  { %v305_v55 = vpop.xlane.xlu1 %304 }
 0x363   :  { %885 = vrcp.f32 %v305_v55 }
 0x36d   :  { %v886_v56 = vpop.eup %885 }
 0x36e   :  { %v307_v57 = vmul.f32 %v886_v56, %v884_v47 }
 0x370   :  { %753 = vmatmul.mubr.msk.f32.vlgmr.msra.gmra.mrb[4].mxu1 %vm296_vm3, %v307_v57 }
 0x371   :  { %782 = vmatprep.mubr.msk.f32.mxu1 %vm913_vm0, %v914_v16  ;;  %836 = vmatpush3.bf16.msra.mxu1 %v835_v60 }
 0x372   :  { %837 = vmatprep.subr.bf16.mxu1 %v911_v7 }
 0x375   :  { %839 = vmatpush3.bf16.msra.mxu1 %v838_v63 }
 0x376   :  { %840 = vmatprep.subr.bf16.mxu1 %v911_v7 }
 0x379   :  { %842 = vmatpush3.bf16.msra.mxu1 %v841_v2 }
 0x37a   :  { %843 = vmatprep.subr.bf16.mxu1 %v911_v7 }
 0x37d   :  { %845 = vmatpush3.bf16.msra.mxu1 %v844_v21 }
 0x443   :  { %v380_v9 = vpop.f32.mrb[4].mxu1 }
 0x444   :  { %v754_v10 = vpop.f32.mrb[5].mxu1  ;;  %764 = vmatmul.mubr.msk.f32.vlgmr.msra.gmra.mrb[2].mxu0 %vm219_vm2, %v380_v9 }
 0x445   :  { %848 = vmatpush3.bf16.msra.mxu0 %v847_v5  ;;  %801 = vmatprep.mubr.msk.f32.mxu0 %vm913_vm0, %v914_v16  ;;  %v476_v16 = vld [vmem:[%s1128_s5 + $0x38] sm:$0xff] }
 0x446   :  { %849 = vmatprep.subr.bf16.mxu0 %v911_v7  ;;  %v856_v20 = vpack.c.bf16 %v476_v16, %v475_v15 }
 0x449   :  { %851 = vmatpush3.bf16.msra.mxu0 %v850_v11 }
 0x44a   :  { %852 = vmatprep.subr.bf16.mxu0 %v911_v7 }
 0x44d   :  { %854 = vmatpush3.bf16.msra.mxu0 %v853_v14 }
 0x44e   :  { %855 = vmatprep.subr.bf16.mxu0 %v911_v7  ;;  %v657_v7 = vld [vmem:[%s1127_s4] ss:$0 sm:$0xff]  ;;  %s887_s4 = scalar_lea.vmem %s645_s17, 128 }
 0x44f   :  { %p888_p0 = scmp.ne.s32.totalorder %s645_s17, %s887_s4  ;;  %p893_p2 = scmp.lt.s32.totalorder %s887_s4, %s887_s4 }
 0x451   :  { %857 = vmatpush3.bf16.msra.mxu0 %v856_v20  ;;  %p894_p3 = por %p893_p2, %p892_p1 }
 0x453   :  { %p895_p4 = pnand %p894_p3, %p888_p0 }
 0x454   :  { %802 = vmatmul.mubr.msk.f32.vlgmr.msra.gmra.mrb[4].mxu0 %vm40_vm1, %v1001_v18 }
 0x517   :  { %v464_v22 = vpop.f32.mrb[2].mxu0 }
 0x518   :  { %v465_v23 = vadd.f32 %v657_v7, %v464_v22  ;;  %v765_v24 = vpop.f32.mrb[3].mxu0 }
 0x51a   :  { %v468_v25 = vmax.f32 %v465_v23, 0.0 }
 0x51c   :  { %783 = vmatmul.mubr.msk.f32.vlgmr.msra.gmra.mrb[6].mxu1 %vm40_vm1, %v468_v25 }
 0x527   :  { %v624_v26 = vpop.f32.mrb[4].mxu0 }
 0x528   :  { %v803_v27 = vpop.f32.mrb[5].mxu0 }
 0x5ef   :  { %v554_v28 = vpop.f32.mrb[6].mxu1 }
 0x5f0   :  { %v625_v30 = vadd.f32 %v624_v26, %v554_v28  ;;  %v784_v31 = vpop.f32.mrb[7].mxu1 }
 0x5f2   :  { %v635_v18 = vadd.f32 %v661_v29, %v625_v30 }
 0x5f4   :  { %v636_v32 = vmax.f32 %v635_v18, 0.0 }
 0x5f6   :  { %637 = vst.msk [vmem:[#allocation2] sm:$0xff] %vm219_vm2, %v636_v32 }
 0x5f7   :  { %898 = shalt.err (!%p895_p4)
}
 0x5f8   :  { %s899_s7 = scalar_lea.hbm %s1131_s8, 128 }
 0x5f9   :  { %p900_p5 = scmp.ne.s32.totalorder %s1131_s8, %s899_s7  ;;  %p903_p6 = scmp.lt.u32.totalorder %s899_s7, %s1131_s8 }
 0x5fb   :  { %p905_p7 = pnand %p903_p6, %p900_p5 }
 0x5fd   :  { %908 = shalt.err (!%p905_p7)
}
 0x5fe   :  { %647 = dma.vmem_to_hbm [thread:$0]  %s645_s17, 128, %s1131_s8, [#allocation3]  }
 0x5ff   :  { %909 = dma.done.wait [#allocation3], 128  }
 0x600   :  { %910 = vsyncadd [#allocation3], 4294967168 }
 0x601   :  { %651 = vsyncpa [#allocation3], 1 }

</bundles_post_ra>
